<compile_context>
chip_gen: v6e
topology: v6e:2x2x1
jax: 0.10.0
libtpu: 0.0.40
codegen_flags: <defaults>
</compile_context>

<pallas_src>
import functools
import math

import jax
import jax.numpy as jnp
from jax.experimental import pallas as pl
from jax.experimental.pallas import tpu as pltpu


def _round_up(x: int, m: int) -> int:
    return ((x + m - 1) // m) * m


# ---------------------------------------------------------------------------
# Kernel: fused multi-layer Linear(+ReLU) over one M-tile.
# Arg layout: (x_ref, w0, b0, w1, b1, ..., o_ref)
# ---------------------------------------------------------------------------
def _mlp_kernel(x_ref, *refs, num_layers: int):
    o_ref = refs[-1]
    h = x_ref[...]                            # (TM, K0) f32
    for i in range(num_layers):
        w = refs[2 * i][...]                  # (K, N) bf16, resident in VMEM
        b = refs[2 * i + 1][...]              # (1, N) f32 -> broadcasts over rows
        # bf16 x bf16 MXU matmul with f32 accumulation; bias-add / ReLU stay in f32.
        y = jnp.dot(h.astype(w.dtype), w, preferred_element_type=jnp.float32) + b
        if i < num_layers - 1:                # hidden layers: ReLU (Dropout = identity at eval)
            y = jnp.maximum(y, 0.0)
        h = y
    o_ref[...] = h.astype(o_ref.dtype)


# ---------------------------------------------------------------------------
# Parameter init (matches the PyTorch module's __init__) and padding / casting.
# ---------------------------------------------------------------------------
def init_mlp_params(key, input_dim, mlp_dims):
    """Weights: kaiming_normal_(a=0, mode='fan_out') => std = sqrt(2/out_features),
    stored transposed as [in, out] for the kernel.
    Biases: PyTorch nn.Linear default U(-1/sqrt(fan_in), 1/sqrt(fan_in))."""
    dims = [input_dim] + list(mlp_dims)
    params = []
    for i in range(len(dims) - 1):
        d_in, d_out = dims[i], dims[i + 1]
        key, kw, kb = jax.random.split(key, 3)
        std = math.sqrt(2.0 / d_out)
        w = std * jax.random.normal(kw, (d_in, d_out), dtype=jnp.float32)
        bound = 1.0 / math.sqrt(d_in)
        b = jax.random.uniform(kb, (d_out,), jnp.float32, -bound, bound)
        params.append((w, b))
    return params


def pad_params(params, lane=128, weight_dtype=jnp.bfloat16):
    """Zero-pad hidden feature dims to 128 lanes once, up front.
    The FIRST layer's K (true input dim) and the LAST layer's N (true output dim)
    are left unpadded so the kernel reads x and writes the output at their natural
    widths (no host-side padding pass, no post-kernel slice pass).
    Weights are pre-cast to bf16 for the MXU; biases stay f32.
    Padded weight rows/cols and bias entries are zero, so padded activation
    columns stay exactly zero through every layer."""
    n = len(params)
    padded = []
    for i, (w, b) in enumerate(params):
        d_in, d_out = w.shape
        kp = d_in if i == 0 else _round_up(d_in, lane)
        np_ = d_out if i == n - 1 else _round_up(d_out, lane)
        wp = jnp.zeros((kp, np_), jnp.float32).at[:d_in, :d_out].set(w).astype(weight_dtype)
        bp = jnp.zeros((1, np_), jnp.float32).at[0, :d_out].set(b)
        padded.append((wp, bp))
    return padded


def _choose_tm(M, *, tm_cap=2048, min_steps=2):
    """Row-tile size: big tiles amortize per-step overhead (serial grid on v5e/v6e)
    while guaranteeing >= min_steps grid steps so v7x's two TensorCores both get
    work on the 'parallel' grid axis. TM is a multiple of 8 (or == M when tiny)."""
    if M <= 8:
        return M                                   # single tiny block (== full dim, legal)
    steps = max(min_steps, pl.cdiv(M, tm_cap))
    return min(_round_up(pl.cdiv(M, steps), 8), tm_cap)


# ---------------------------------------------------------------------------
# Wrapper: flatten leading dims, launch the fused kernel, reshape back (free).
# ---------------------------------------------------------------------------
def mlp_forward(x, padded_params, out_dim, *, tm_cap=2048):
    # TODO(synk): training-mode Dropout (p=0.1) omitted; identity at inference.
    lead = x.shape[:-1]
    D = x.shape[-1]
    M = int(math.prod(lead)) if lead else 1
    h = x.reshape(M, D)

    num_layers = len(padded_params)
    assert padded_params[-1][0].shape[1] == out_dim

    TM = _choose_tm(M, tm_cap=tm_cap)
    grid = (pl.cdiv(M, TM),)

    # Input block last dim == full array dim (no lane padding needed).
    in_specs = [pl.BlockSpec((TM, D), lambda i: (i, 0))]
    flat_wb = []
    for w, b in padded_params:
        # Grid-invariant (index_map (0,0)) -> resident in VMEM, not re-fetched per tile.
        in_specs.append(pl.BlockSpec(w.shape, lambda i: (0, 0)))
        in_specs.append(pl.BlockSpec(b.shape, lambda i: (0, 0)))
        flat_wb += [w, b]

    flops = int(sum(2 * M * w.shape[0] * w.shape[1] for w, _ in padded_params))
    bytes_accessed = int(
        h.size * 4 + M * out_dim * 4
        + sum(w.size * w.dtype.itemsize + b.size * 4 for w, b in padded_params))

    kern = functools.partial(_mlp_kernel, num_layers=num_layers)

    out = pl.pallas_call(
        kern,
        out_shape=jax.ShapeDtypeStruct((M, out_dim), jnp.float32),
        grid=grid,
        in_specs=in_specs,
        out_specs=pl.BlockSpec((TM, out_dim), lambda i: (i, 0)),
        compiler_params=pltpu.CompilerParams(dimension_semantics=("parallel",)),
        cost_estimate=pl.CostEstimate(flops=flops, transcendentals=0,
                                      bytes_accessed=bytes_accessed),
    )(h, *flat_wb)

    return out.reshape(*lead, out_dim)


if __name__ == "__main__":
    key = jax.random.PRNGKey(0)
    k_x1, k_x2, k_p = jax.random.split(key, 3)

    # Small shapes: batch=2, seq=8, input_dim=32, mlp_dims=[64, 48]
    B, T, input_dim = 2, 8, 32
    mlp_dims = [64, 48]  # last entry is the output dim (self.last_layer)

    params = init_mlp_params(k_p, input_dim, mlp_dims)
    padded = pad_params(params)

    def ref_forward(xx):
        """Pure-JAX reference mirroring the kernel's math (bf16 weights, f32 accum)."""
        r = xx.reshape(-1, input_dim)
        for i, (w, b) in enumerate(params):
            r = jnp.dot(r.astype(jnp.bfloat16), w.astype(jnp.bfloat16),
                        preferred_element_type=jnp.float32) + b
            if i < len(params) - 1:
                r = jnp.maximum(r, 0.0)
        return r.reshape(*xx.shape[:-1], mlp_dims[-1])

    # Case 1: M = 16 rows -> TM = 8, 2 grid steps (exercises the multi-tile path).
    x1 = jax.random.normal(k_x1, (B, T, input_dim), dtype=jnp.float32)
    out1 = jax.block_until_ready(mlp_forward(x1, padded, out_dim=mlp_dims[-1]))
    assert out1.shape == (B, T, mlp_dims[-1]), out1.shape
    assert bool(jnp.all(jnp.isfinite(out1)))
    ref1 = ref_forward(x1)
    assert jnp.allclose(out1, ref1, atol=5e-3, rtol=5e-3), float(jnp.max(jnp.abs(out1 - ref1)))

    # Case 2: M = 21 rows -> TM = 16, ragged last block (exercises boundary handling).
    x2 = jax.random.normal(k_x2, (3, 7, input_dim), dtype=jnp.float32)
    out2 = jax.block_until_ready(mlp_forward(x2, padded, out_dim=mlp_dims[-1]))
    assert out2.shape == (3, 7, mlp_dims[-1]), out2.shape
    assert bool(jnp.all(jnp.isfinite(out2)))
    ref2 = ref_forward(x2)
    assert jnp.allclose(out2, ref2, atol=5e-3, rtol=5e-3), float(jnp.max(jnp.abs(out2 - ref2)))

    print("KERNEL_OK")
</pallas_src>

<mosaic_0001>
module attributes {stable_mosaic.version = 11 : i64} {
  func.func @_mlp_kernel(%arg0: i32, %arg1: memref<8x32xf32, #tpu.memory_space<vmem>>, %arg2: memref<32x128xbf16, #tpu.memory_space<vmem>>, %arg3: memref<1x128xf32, #tpu.memory_space<vmem>>, %arg4: memref<128x48xbf16, #tpu.memory_space<vmem>>, %arg5: memref<1x48xf32, #tpu.memory_space<vmem>>, %arg6: memref<8x48xf32, #tpu.memory_space<vmem>>) attributes {dimension_semantics = [#tpu.dimension_semantics<parallel>], iteration_bounds = array<i64: 2>, scalar_prefetch = 0 : i64, scratch_operands = 0 : i64, tpu.core_type = #tpu.core_type<tc>, window_params = [{transform_indices = @transform_0, window_bounds = array<i64: 8, 32>}, {pipeline_mode = #tpu.pipeline_mode<synchronous>, transform_indices = @transform_1, window_bounds = array<i64: 32, 128>}, {pipeline_mode = #tpu.pipeline_mode<synchronous>, transform_indices = @transform_2, window_bounds = array<i64: 1, 128>}, {pipeline_mode = #tpu.pipeline_mode<synchronous>, transform_indices = @transform_3, window_bounds = array<i64: 128, 48>}, {pipeline_mode = #tpu.pipeline_mode<synchronous>, transform_indices = @transform_4, window_bounds = array<i64: 1, 48>}, {transform_indices = @transform_5, window_bounds = array<i64: 8, 48>}]} {
    %c0 = arith.constant 0 : index
    %c0_0 = arith.constant 0 : index
    %0 = vector.load %arg1[%c0, %c0_0] : memref<8x32xf32, #tpu.memory_space<vmem>>, vector<8x32xf32>
    %c0_1 = arith.constant 0 : index
    %c0_2 = arith.constant 0 : index
    %1 = vector.load %arg2[%c0_1, %c0_2] : memref<32x128xbf16, #tpu.memory_space<vmem>>, vector<32x128xbf16>
    %c0_3 = arith.constant 0 : index
    %c0_4 = arith.constant 0 : index
    %2 = vector.load %arg3[%c0_3, %c0_4] : memref<1x128xf32, #tpu.memory_space<vmem>>, vector<1x128xf32>
    %3 = arith.truncf %0 : vector<8x32xf32> to vector<8x32xbf16>
    %cst = arith.constant dense<0.000000e+00> : vector<8x128xf32>
    %4 = tpu.matmul %3, %1, %cst {dimension_numbers = #tpu.dot_dimension_numbers<[1], [0], [0], [1], [0, 0, 1, 1], [], []>} : vector<8x32xbf16>, vector<32x128xbf16>, vector<8x128xf32> -> vector<8x128xf32>
    %5 = vector.broadcast %2 : vector<1x128xf32> to vector<8x128xf32>
    %6 = arith.addf %4, %5 : vector<8x128xf32>
    %cst_5 = arith.constant 0.000000e+00 : f32
    %7 = vector.broadcast %cst_5 : f32 to vector<8x128xf32>
    %8 = arith.maximumf %6, %7 : vector<8x128xf32>
    %c0_6 = arith.constant 0 : index
    %c0_7 = arith.constant 0 : index
    %9 = vector.load %arg4[%c0_6, %c0_7] : memref<128x48xbf16, #tpu.memory_space<vmem>>, vector<128x48xbf16>
    %c0_8 = arith.constant 0 : index
    %c0_9 = arith.constant 0 : index
    %10 = vector.load %arg5[%c0_8, %c0_9] : memref<1x48xf32, #tpu.memory_space<vmem>>, vector<1x48xf32>
    %11 = arith.truncf %8 : vector<8x128xf32> to vector<8x128xbf16>
    %cst_10 = arith.constant dense<0.000000e+00> : vector<8x48xf32>
    %12 = tpu.matmul %11, %9, %cst_10 {dimension_numbers = #tpu.dot_dimension_numbers<[1], [0], [0], [1], [0, 0, 1, 1], [], []>} : vector<8x128xbf16>, vector<128x48xbf16>, vector<8x48xf32> -> vector<8x48xf32>
    %13 = vector.broadcast %10 : vector<1x48xf32> to vector<8x48xf32>
    %14 = arith.addf %12, %13 : vector<8x48xf32>
    %c0_11 = arith.constant 0 : index
    %c0_12 = arith.constant 0 : index
    %15 = vector.load %arg6[%c0_11, %c0_12] : memref<8x48xf32, #tpu.memory_space<vmem>>, vector<8x48xf32>
    tpu.vector_store %arg6[%c0_11, %c0_12], %14 {strides = array<i32>} : memref<8x48xf32, #tpu.memory_space<vmem>>, vector<8x48xf32>,
    return
  }
  func.func @transform_0(%arg0: i32) -> (i32, i32) {
    %c0_i32 = arith.constant 0 : i32
    %c0_i32_0 = arith.constant 0 : i32
    return %arg0, %c0_i32 : i32, i32
  }
  func.func @transform_1(%arg0: i32) -> (i32, i32) {
    %c0_i32 = arith.constant 0 : i32
    %c0_i32_0 = arith.constant 0 : i32
    %c0_i32_1 = arith.constant 0 : i32
    return %c0_i32, %c0_i32_0 : i32, i32
  }
  func.func @transform_2(%arg0: i32) -> (i32, i32) {
    %c0_i32 = arith.constant 0 : i32
    %c0_i32_0 = arith.constant 0 : i32
    %c0_i32_1 = arith.constant 0 : i32
    return %c0_i32, %c0_i32_0 : i32, i32
  }
  func.func @transform_3(%arg0: i32) -> (i32, i32) {
    %c0_i32 = arith.constant 0 : i32
    %c0_i32_0 = arith.constant 0 : i32
    %c0_i32_1 = arith.constant 0 : i32
    return %c0_i32, %c0_i32_0 : i32, i32
  }
  func.func @transform_4(%arg0: i32) -> (i32, i32) {
    %c0_i32 = arith.constant 0 : i32
    %c0_i32_0 = arith.constant 0 : i32
    %c0_i32_1 = arith.constant 0 : i32
    return %c0_i32, %c0_i32_0 : i32, i32
  }
  func.func @transform_5(%arg0: i32) -> (i32, i32) {
    %c0_i32 = arith.constant 0 : i32
    %c0_i32_0 = arith.constant 0 : i32
    return %arg0, %c0_i32 : i32, i32
  }
}

</mosaic_0001>

<bundles_post_ra>
// kernel: tpu_custom_call.1
= control target key start
LH: loop header
LB: loop body
LE: loop exit
PB: predicated region body
PF: predicated region fallthrough
CT: control target
= control target key end

     0   :  { %10 = vsyncpa [#allocation3], 0  ;;  %s822_s0 = inlined_call_operand.vmem [shape: f32[16,32], index: 0, kind: input, shape index: {}]   ;;  %s823_s1 = inlined_call_operand.vmem [shape: bf16[32,128], index: 1, kind: input, shape index: {}]   ;;  %s824_s2 = inlined_call_operand.vmem [shape: f32[1,128], index: 2, kind: input, shape index: {}]   ;;  %s825_s3 = inlined_call_operand.vmem [shape: bf16[128,48], index: 3, kind: input, shape index: {}]   ;;  %s826_s4 = inlined_call_operand.vmem [shape: f32[1,48], index: 4, kind: input, shape index: {}]   ;;  %s827_s5 = inlined_call_operand.hbm [shape: f32[16,48], index: 5, kind: output, shape index: {}]  }
   0x1   :  { %12 = vsyncpa [#allocation3 + $0x1], 0  ;;  %s687_s18 = smov 0   ;;  %s689_s19 = smov 0  }
   0x2   :  { %s691_s20 = smov 0   ;;  %s693_s21 = smov 0  }
   0x3 LB: > { %s708_s22 = sadd.s32 4294967295, %s652_s21   ;;  %s478_s23 = sadd.s32 4294967294, %s652_s21   ;;  %s652_s21 = sphi %s693_s21, %s833_s21   ;;  %s648_s20 = sphi %s691_s20, %s832_s20   ;;  %s644_s19 = sphi %s689_s19, %s831_s19   ;;  %s640_s18 = sphi %s687_s18, %s830_s18  }
   0x4   : > { %s712_s24 = sadd.s32 1, %s652_s21   ;;  %s135_s25 = sadd.s32 1, %s648_s20 }
   0x5   : > { %s132_s26 = ssub.s32 %s652_s21, %s712_s24  ;;  %p145_p0 = scmp.ne.s32.totalorder %s648_s20, %s644_s19 }
   0x6   : > { %p133_p1 = scmp.eq.s32.totalorder %s132_s26, 0  ;;  %p146_p2 = scmp.eq.s32.totalorder %s708_s22, 1 }
   0x7   : > { %p151_p3 = scmp.ne.s32.totalorder %s644_s19, %s640_s18  ;;  %p152_p4 = scmp.eq.s32.totalorder %s478_s23, 1 }
   0x8   : > { %s723_s27 = scalar_select %p133_p1, %s648_s20, %s135_s25  }
   0x9   : > { %p725_p5 = por %p146_p2, %p145_p0  ;;  %p729_p6 = por %p152_p4, %p151_p3 }
   0xa   : > { %p481_p7 = scmp.ge.s32.totalorder %s652_s21, 1  ;;  %p189_p8 = scmp.lt.s32.totalorder %s652_s21, 3 }
   0xc   : > { %p190_p9 = pnand %p481_p7, %p189_p8 }
   0xd   : > { %p216_p10 = scmp.lt.s32.totalorder (!%p190_p9), %s708_s22, 1  ;;  %s213_s16 = sand.u32 (!%p190_p9), 1, %s644_s19  }
   0xe   : > { %193 = sbr.rel (%p190_p9) target bundleno = 436 (0x1b4), region = 40  ;;  %s498_s26 = sshll.u32 (!%p190_p9), %s708_s22, 7 }
   0xf   : > { %s781_s9 = scalar_lea.hbm (!%p190_p9), %s827_s5, %s498_s26  ;;  %s406_s10 = scalar_lea.sflag (!%p190_p9), [#allocation3], %s213_s16 }
  0x13   : > { %v582_v0 = vld [vmem:[%s823_s1 + $0x8] sm:$0xff]   ;;  %v654_v1 = vmov 0.0   ;;  %v583_v2 = vld [vmem:[%s823_s1] sm:$0xff]   ;;  %vm655_vm0 = vmmov 0   ;;  %v584_v3 = vld [vmem:[%s825_s3 + $0x38] sm:$0xff]   ;;  %s217_s11 = scalar_select %p216_p10, %s708_s22, 1 }
  0x14   : > { %513 = vmatprep.subr.bf16.mxu0 %v654_v1  ;;  %521 = vmatprep.subr.bf16.mxu1 %v654_v1  ;;  %v585_v4 = vld [vmem:[%s825_s3 + $0x30] sm:$0xff]   ;;  %vm246_vm1 = vcmask 261120   ;;  %v586_v6 = vld [vmem:[%s825_s3 + $0x28] sm:$0xff]   ;;  %v587_v8 = vld [vmem:[%s825_s3 + $0x20] sm:$0xff]   ;;  %vm403_vm2 = vcmask 392192  }
  0x15   : > { %514 = vmatpush3.bf16.msra.mxu0 %v582_v0  ;;  %517 = vmatprep.mubr.msk.bf16.mxu0 %vm655_vm0, %v654_v1  ;;  %s483_s14 = sshll.u32 %s217_s11, 3  ;;  %v588_v9 = vld [vmem:[%s825_s3 + $0x18] sm:$0xff]   ;;  %v589_v10 = vld [vmem:[%s825_s3 + $0x10] sm:$0xff]   ;;  %v590_v11 = vld [vmem:[%s825_s3 + $0x8] sm:$0xff]   ;;  %s656_s11 = smov [#allocation2]  }
  0x16   : > { %515 = vmatprep.subr.bf16.mxu0 %v654_v1  ;;  %537 = vmatprep.mubr.msk.bf16.mxu1 %vm655_vm0, %v654_v1  ;;  %s219_s17 = scalar_lea.vmem %s822_s0, %s483_s14  ;;  %v591_v12 = vld [vmem:[%s825_s3] sm:$0xff]   ;;  %s596_s12 = sshll.u32 %s656_s11, 4  ;;  %s597_s12 = int_to_ptr.vmem [resolvable:$false] %s596_s12 }
  0x17   : > { %522 = vmatpush3.bf16.msra.mxu1 %v584_v3  ;;  %v221_v5 = vld [vmem:[%s219_s17] sm:$0xff]  ;;  %s482_s17 = sshll.u32 %s213_s16, 3  ;;  %s598_s13 = scalar_lea.vmem %s597_s12, 256 }
  0x18   : > { %523 = vmatprep.subr.bf16.mxu1 %v654_v1  ;;  %v227_v7 = vpack.c.bf16 %v221_v5, %v221_v5  ;;  %v484_v13 = vld [vmem:[%s824_s2] ss:$0 sm:$0xff]  ;;  %s215_s30 = scalar_lea.vmem [#allocation2], %s482_s17 }
  0x19   : > { %516 = vmatpush3.bf16.msra.mxu0 %v583_v2  ;;  %v488_v21 = vld [vmem:[%s826_s4] ss:$0 sm:$0xff]  ;;  %s419_s6 = sshll.u32 %s215_s30, 4  ;;  %s783_s6 = int_to_ptr.vmem [resolvable:$true] %s419_s6 }
  0x1a   : > { %s592_s22 = scalar_lea.vmem %s783_s6, 128  ;;  %p599_p0 = scmp.lt.s32.totalorder %s783_s6, %s597_s12 }
  0x1b   : > { %524 = vmatpush3.bf16.msra.mxu1 %v585_v4  ;;  %p593_p11 = scmp.ne.s32.totalorder %s783_s6, %s592_s22  ;;  %p600_p1 = scmp.lt.s32.totalorder %s598_s13, %s592_s22 }
  0x1c   : > { %525 = vmatprep.subr.bf16.mxu1 %v654_v1  ;;  %518 = vmatmul.mubr.msk.bf16.vlgmr.msra.gmra.mxu0 %vm246_vm1, %v227_v7 }
  0x1d   : > { %p594_p12 = pnand %p593_p11, %p725_p5  ;;  %p601_p2 = por %p600_p1, %p599_p0 }
  0x1f   : > { %526 = vmatpush3.bf16.msra.mxu1 %v586_v6  ;;  %p595_p13 = pneg %p594_p12 }
  0x20   : > { %527 = vmatprep.subr.bf16.mxu1 %v654_v1 }
  0x21   : > { %p602_p3 = pnand %p601_p2, %p595_p13 }
  0x23   : > { %528 = vmatpush3.bf16.msra.mxu1 %v587_v8 }
  0x24   : > { %529 = vmatprep.subr.bf16.mxu1 %v654_v1 }
  0x27   : > { %530 = vmatpush3.bf16.msra.mxu1 %v588_v9 }
  0x28   : > { %531 = vmatprep.subr.bf16.mxu1 %v654_v1 }
  0x2b   : > { %532 = vmatpush3.bf16.msra.mxu1 %v589_v10 }
  0x2c   : > { %533 = vmatprep.subr.bf16.mxu1 %v654_v1 }
  0x2f   : > { %534 = vmatpush3.bf16.msra.mxu1 %v590_v11 }
  0x30   : > { %535 = vmatprep.subr.bf16.mxu1 %v654_v1 }
  0x33   : > { %536 = vmatpush3.bf16.msra.mxu1 %v591_v12 }
  0xdc   : > { %v284_v14 = vpop.f32.mrf.mxu0 }
  0xdd   : > { %v285_v15 = vadd.f32 %v484_v13, %v284_v14 }
  0xde   : > { %v519_v16 = vpop.f32.mrf.mxu0 }
  0xdf   : > { %v290_v17 = vmax.f32 %v285_v15, 0.0 }
  0xe0   : > { %v287_v18 = vpop.f32.mrf.mxu0 }
  0xe1   : > { %v308_v19 = vpack.c.bf16 %v290_v17, %v290_v17 }
  0xe2   : > { %v520_v20 = vpop.f32.mrf.mxu0 }
  0xe3   : > { %538 = vmatmul.mubr.bf16.vlgmr.msra.gmra.mxu1 %v308_v19 }
 0x1a3   : > { %v397_v22 = vpop.f32.mrf.mxu1 }
 0x1a4   : > { %v398_v23 = vadd.f32 %v488_v21, %v397_v22 }
 0x1a5   : > { %v539_v24 = vpop.f32.mrf.mxu1 }
 0x1a6   : > { %404 = vst.msk [vmem:[%s215_s30] sm:$0xff] %vm403_vm2, %v398_v23 }
 0x1a7   : > { %v400_v25 = vpop.f32.mrf.mxu1 }
 0x1a8   : > { %605 = shalt.err (!%p602_p3)
}
 0x1a9   : > { %s606_s14 = scalar_lea.hbm %s781_s9, 128  ;;  %s610_s17 = scalar_lea.hbm %s827_s5, 256 }
 0x1aa   : > { %p607_p4 = scmp.ne.s32.totalorder %s781_s9, %s606_s14  ;;  %p611_p9 = scmp.lt.s32.totalorder %s781_s9, %s827_s5 }
 0x1ab   : > { %p612_p10 = scmp.lt.s32.totalorder %s610_s17, %s606_s14 }
 0x1ac   : > { %p608_p7 = pnand %p607_p4, %p725_p5 }
 0x1ad   : > { %p613_p11 = por %p612_p10, %p611_p9 }
 0x1ae   : > { %p609_p8 = pneg %p608_p7 }
 0x1b0   : > { %p614_p12 = pnand %p613_p11, %p609_p8 }
 0x1b2   : > { %617 = shalt.err (!%p614_p12)
}
 0x1b3   : > { %541 = dma.vmem_to_hbm [thread:$0]  (%p725_p5), %s783_s6, 128, %s781_s9, %s406_s10   ;;  %v540_v26 = vpop.f32.mrf.mxu1 }
 0x1b4 PF: > { %p547_p13 = scmp.ge.s32.totalorder %s652_s21, 2  ;;  %s431_s26 = sand.u32 1, %s640_s18  }
 0x1b5   : > { %s432_s30 = scalar_lea.sflag [#allocation3], %s431_s26 }
 0x1b6   : > { %p544_p0 = pnand %p547_p13, %p729_p6 }
 0x1b8   : > { %p545_p1 = pneg %p544_p0 }
 0x1ba   : > { %635 = dma.done.wait (%p545_p1), %s432_s30, 128  }
 0x1bb   : > { %637 = vsyncadd (%p545_p1), %s432_s30, 4294967168  ;;  %p15_p2 = scmp.ge.s32.totalorder %s712_s24, 4   ;;  %s830_s18 = smov %s644_s19 }
 0x1bc   : > { %s831_s19 = smov %s648_s20  ;;  %s832_s20 = smov %s723_s27 }
 0x1bd   : > { %s833_s21 = smov %s712_s24  ;;  %17 = sbr.rel (!%p15_p2) target bundleno = 3 (0x3), region = 75 }
 0x1c2   :  { %437 = vsyncpa [#allocation3], 1 }
 0x1c3   :  { %439 = vsyncpa [#allocation3 + $0x1], 1 }

</bundles_post_ra>
